<compile_context>
chip_gen: v6e
topology: v6e:2x2x1
jax: 0.10.0
libtpu: 0.0.40
codegen_flags: <defaults>
</compile_context>

<pallas_src>
import jax
import jax.numpy as jnp
from jax.experimental import pallas as pl
from jax.experimental.pallas import tpu as pltpu

# ---- Module hyperparameters (mirroring GraphEncoder.__init__) --------------
INPUT_DIM = 16           # input_dim
GCN_OUT = 8              # gcn_output_dim
HEADS = 2                # gcn_params['head']
HF = GCN_OUT * HEADS     # per-layer output width (heads concatenated)
DENSE_OUT = 32           # dense_output_dim
N_LAYERS = 2             # gcn_laysers_num
NEG_SLOPE = 0.2          # GATConv default negative_slope
N_NODES = 8              # nodes per graph
NEG_INF = -1e30          # additive mask value (finite, dominates any real logit)
TARGET_PACKED_NODES = 128  # pack graphs until ~one lane width of nodes per step


# ---- Fused Pallas kernel ----------------------------------------------------
def _gat_layer(x, mask, w_ref, att_ref, b_ref):
    """One GATConv layer on a packed (M, Fin) node slab. Returns (M, HF) f32."""
    xp = jnp.dot(x.astype(jnp.bfloat16), w_ref[...],
                 preferred_element_type=jnp.float32)            # (M, HF)  MXU
    xp_b = xp.astype(jnp.bfloat16)
    # Attention scores for all heads with one MXU matmul against a host-built
    # block-diagonal (HF, 2H) matrix: column 2h = a_src[h], 2h+1 = a_dst[h].
    s = jnp.dot(xp_b, att_ref[...],
                preferred_element_type=jnp.float32)             # (M, 2H)
    s_t = s.T                                                   # one XLU transpose / layer
    outs = []
    for h in range(HEADS):                                      # static unroll over heads
        # e[i, j] = leaky_relu(alpha_dst_i + alpha_src_j) + additive block-diag mask
        e = s[:, 2 * h + 1:2 * h + 2] + s_t[2 * h:2 * h + 1, :]         # (M, M)
        e = jnp.where(e > 0, e, NEG_SLOPE * e) + mask
        e = e - jnp.max(e, axis=1, keepdims=True)               # stable softmax over sources
        p = jnp.exp(e)                                          # masked entries underflow to 0
        inv = pl.reciprocal(jnp.sum(p, axis=1, keepdims=True), approx=False)
        alpha = (p * inv).astype(jnp.bfloat16)
        outs.append(jnp.dot(alpha, xp_b[:, h * GCN_OUT:(h + 1) * GCN_OUT],
                            preferred_element_type=jnp.float32))        # (M, Fout)
    # Head results stay in registers; single lane-concat, no VMEM scratch stores.
    return jnp.concatenate(outs, axis=-1) + b_ref[...]          # (M, HF)


def _graph_encoder_kernel(x_ref, mask_ref,
                          w1_ref, att1_ref, b1_ref,
                          w2_ref, att2_ref, b2_ref,
                          wdt_ref, out_ref):
    mask = mask_ref[...]                                         # (M, M) additive mask
    h1 = _gat_layer(x_ref[...], mask, w1_ref, att1_ref, b1_ref)
    h2 = _gat_layer(h1, mask, w2_ref, att2_ref, b2_ref)
    # accum == 'sum': stack + sum; dropout(p=0) and act_dense=identity are no-ops.
    emb_t = (h1 + h2).T                                          # (HF, M)
    # Lane-dense store: output block is (DENSE_OUT, M); wrapper un-transposes.
    out_ref[...] = jnp.dot(wdt_ref[...], emb_t.astype(jnp.bfloat16),
                           preferred_element_type=jnp.float32)


def _const_spec(arr):
    """Full-array operand, same block every grid step (parameters)."""
    nd = arr.ndim
    return pl.BlockSpec(arr.shape, lambda s, _nd=nd: (0,) * _nd)


def graph_encoder_forward(params, x, adj_bias, batch):
    """x: (B, N, INPUT_DIM) f32; adj_bias: (B, N, N) additive mask (0 edge / NEG_INF).
    Returns (embeddings (B*N, DENSE_OUT) f32, batch), like the PyTorch module."""
    B, N, _ = x.shape
    gps = min(B, max(1, TARGET_PACKED_NODES // N))   # graphs packed per grid step
    S = -(-B // gps)                                 # macro steps (>=2 once B*N > 128)
    Bp = S * gps
    M = gps * N

    # Pack `gps` graphs' nodes into one (M, Fin) slab per macro-step (pad with zeros).
    if Bp > B:
        x = jnp.concatenate([x, jnp.zeros((Bp - B, N, INPUT_DIM), x.dtype)], axis=0)
        adj_bias = jnp.concatenate(
            [adj_bias, jnp.full((Bp - B, N, N), NEG_INF, adj_bias.dtype)], axis=0)
    x_packed = x.reshape(S, M, INPUT_DIM)

    # Block-diagonal additive mask per step: cross-graph entries = NEG_INF.
    adj_s = adj_bias.reshape(S, gps, N, N)
    same_graph = jnp.eye(gps, dtype=bool)[None, :, None, :, None]       # (1,gps,1,gps,1)
    mask = jnp.where(same_graph, adj_s[:, :, :, None, :], NEG_INF).reshape(S, M, M)

    p1, p2 = params["gat"]
    out_t = pl.pallas_call(
        _graph_encoder_kernel,
        out_shape=jax.ShapeDtypeStruct((S, DENSE_OUT, M), jnp.float32),
        grid=(S,),
        in_specs=[
            pl.BlockSpec((None, M, INPUT_DIM), lambda s: (s, 0, 0)),   # packed nodes
            pl.BlockSpec((None, M, M), lambda s: (s, 0, 0)),           # block-diag mask
            _const_spec(p1["w"]), _const_spec(p1["att"]), _const_spec(p1["bias"]),
            _const_spec(p2["w"]), _const_spec(p2["att"]), _const_spec(p2["bias"]),
            _const_spec(params["dense_w_t"]),
        ],
        out_specs=pl.BlockSpec((None, DENSE_OUT, M), lambda s: (s, 0, 0)),
        compiler_params=pltpu.CompilerParams(
            dimension_semantics=("parallel",)),      # macro-steps shard across TCs (v7x)
    )(x_packed, mask,
      p1["w"], p1["att"], p1["bias"],
      p2["w"], p2["att"], p2["bias"],
      params["dense_w_t"])

    # Un-transpose the lane-dense output and drop graph padding.
    emb = jnp.swapaxes(out_t, 1, 2).reshape(Bp * N, DENSE_OUT)[:B * N]
    return emb, batch


# ---- Glue: graph prep, parameters (plain JAX, host side) -------------------
def build_adj_bias(edge_index, n):
    """Additive mask: 0 where edge j->i (adj[target, source]) or self-loop
    (GATConv default add_self_loops=True), NEG_INF elsewhere."""
    src, dst = edge_index[0], edge_index[1]
    adj = jnp.zeros((n, n), jnp.float32)
    adj = adj.at[dst, src].set(1.0)
    idx = jnp.arange(n)
    adj = adj.at[idx, idx].set(1.0)
    return jnp.where(adj > 0, 0.0, NEG_INF)


def xavier_uniform(key, shape, fan_in, fan_out):
    bound = (6.0 / (fan_in + fan_out)) ** 0.5
    return jax.random.uniform(key, shape, jnp.float32, -bound, bound)


def make_att_mat(att_src, att_dst):
    """(H, Fout) x2 -> block-diagonal (H*Fout, 2H): col 2h = a_src[h], 2h+1 = a_dst[h]."""
    mat = jnp.zeros((HF, 2 * HEADS), jnp.float32)
    for h in range(HEADS):
        mat = mat.at[h * GCN_OUT:(h + 1) * GCN_OUT, 2 * h].set(att_src[h])
        mat = mat.at[h * GCN_OUT:(h + 1) * GCN_OUT, 2 * h + 1].set(att_dst[h])
    return mat


def init_params(key):
    keys = jax.random.split(key, 3 * N_LAYERS + 1)
    params = {"gat": []}
    for l in range(N_LAYERS):
        fin = INPUT_DIM if l == 0 else HF
        kw, ks, kd = keys[3 * l], keys[3 * l + 1], keys[3 * l + 2]
        att_src = xavier_uniform(ks, (HEADS, GCN_OUT), GCN_OUT, GCN_OUT)
        att_dst = xavier_uniform(kd, (HEADS, GCN_OUT), GCN_OUT, GCN_OUT)
        params["gat"].append({
            # stored as (Fin, H*Fout) = transpose of PyG lin weight, bf16 for the MXU
            "w": xavier_uniform(kw, (fin, HF), fin, HF).astype(jnp.bfloat16),
            "att": make_att_mat(att_src, att_dst).astype(jnp.bfloat16),
            "bias": jnp.zeros((1, HF), jnp.float32),   # GATConv bias init = zeros
        })
    # dense_layer: Linear(H*Fout, DENSE_OUT, bias=False); stored transposed (out, in)
    dense_w = xavier_uniform(keys[-1], (HF, DENSE_OUT), HF, DENSE_OUT)
    params["dense_w_t"] = dense_w.T.astype(jnp.bfloat16)
    return params


if __name__ == "__main__":
    key = jax.random.PRNGKey(0)
    k_x, k_e, k_par = jax.random.split(key, 3)

    # A PyG-style Batch of B disjoint graphs, each with N nodes and E edges.
    B, N, E = 4, N_NODES, 14
    x = jax.random.normal(k_x, (B, N, INPUT_DIM), jnp.float32)
    ekeys = jax.random.split(k_e, 2 * B)
    adj_list = []
    for g in range(B):
        src = jax.random.randint(ekeys[2 * g], (E,), 0, N)
        dst = jax.random.randint(ekeys[2 * g + 1], (E,), 0, N)
        edge_index = jnp.stack([src, dst]).astype(jnp.int32)      # (2, E)
        adj_list.append(build_adj_bias(edge_index, N))
    adj_bias = jnp.stack(adj_list)                                # (B, N, N)
    batch = jnp.repeat(jnp.arange(B, dtype=jnp.int32), N)         # node -> graph id

    params = init_params(k_par)
    emb, batch_out = graph_encoder_forward(params, x, adj_bias, batch)
    jax.block_until_ready(emb)
    assert emb.shape == (B * N, DENSE_OUT)
    assert batch_out.shape == (B * N,)
    assert bool(jnp.all(jnp.isfinite(emb)))
    print("KERNEL_OK")
</pallas_src>

<mosaic_0001>
module attributes {stable_mosaic.version = 11 : i64} {
  func.func @_graph_encoder_kernel(%arg0: i32, %arg1: memref<1x32x16xf32, #tpu.memory_space<vmem>>, %arg2: memref<1x32x32xf32, #tpu.memory_space<vmem>>, %arg3: memref<16x16xbf16, #tpu.memory_space<vmem>>, %arg4: memref<16x4xbf16, #tpu.memory_space<vmem>>, %arg5: memref<1x16xf32, #tpu.memory_space<vmem>>, %arg6: memref<16x16xbf16, #tpu.memory_space<vmem>>, %arg7: memref<16x4xbf16, #tpu.memory_space<vmem>>, %arg8: memref<1x16xf32, #tpu.memory_space<vmem>>, %arg9: memref<32x16xbf16, #tpu.memory_space<vmem>>, %arg10: memref<1x32x32xf32, #tpu.memory_space<vmem>>) attributes {dimension_semantics = [#tpu.dimension_semantics<parallel>], iteration_bounds = array<i64: 1>, scalar_prefetch = 0 : i64, scratch_operands = 0 : i64, tpu.core_type = #tpu.core_type<tc>, window_params = [{transform_indices = @transform_0, window_bounds = array<i64: 1, 32, 16>}, {transform_indices = @transform_1, window_bounds = array<i64: 1, 32, 32>}, {pipeline_mode = #tpu.pipeline_mode<synchronous>, transform_indices = @transform_2, window_bounds = array<i64: 16, 16>}, {pipeline_mode = #tpu.pipeline_mode<synchronous>, transform_indices = @transform_3, window_bounds = array<i64: 16, 4>}, {pipeline_mode = #tpu.pipeline_mode<synchronous>, transform_indices = @transform_4, window_bounds = array<i64: 1, 16>}, {pipeline_mode = #tpu.pipeline_mode<synchronous>, transform_indices = @transform_5, window_bounds = array<i64: 16, 16>}, {pipeline_mode = #tpu.pipeline_mode<synchronous>, transform_indices = @transform_6, window_bounds = array<i64: 16, 4>}, {pipeline_mode = #tpu.pipeline_mode<synchronous>, transform_indices = @transform_7, window_bounds = array<i64: 1, 16>}, {pipeline_mode = #tpu.pipeline_mode<synchronous>, transform_indices = @transform_8, window_bounds = array<i64: 32, 16>}, {transform_indices = @transform_9, window_bounds = array<i64: 1, 32, 32>}]} {
    %c0 = arith.constant 0 : index
    %c0_0 = arith.constant 0 : index
    %c0_1 = arith.constant 0 : index
    %0 = vector.load %arg2[%c0, %c0_0, %c0_1] : memref<1x32x32xf32, #tpu.memory_space<vmem>>, vector<1x32x32xf32>
    %1 = vector.shape_cast %0 : vector<1x32x32xf32> to vector<32x32xf32>
    %c0_2 = arith.constant 0 : index
    %c0_3 = arith.constant 0 : index
    %c0_4 = arith.constant 0 : index
    %2 = vector.load %arg1[%c0_2, %c0_3, %c0_4] : memref<1x32x16xf32, #tpu.memory_space<vmem>>, vector<1x32x16xf32>
    %3 = vector.shape_cast %2 : vector<1x32x16xf32> to vector<32x16xf32>
    %4 = arith.truncf %3 : vector<32x16xf32> to vector<32x16xbf16>
    %c0_5 = arith.constant 0 : index
    %c0_6 = arith.constant 0 : index
    %5 = vector.load %arg3[%c0_5, %c0_6] : memref<16x16xbf16, #tpu.memory_space<vmem>>, vector<16x16xbf16>
    %cst = arith.constant dense<0.000000e+00> : vector<32x16xf32>
    %6 = tpu.matmul %4, %5, %cst {dimension_numbers = #tpu.dot_dimension_numbers<[1], [0], [0], [1], [0, 0, 1, 1], [], []>} : vector<32x16xbf16>, vector<16x16xbf16>, vector<32x16xf32> -> vector<32x16xf32>
    %7 = arith.truncf %6 : vector<32x16xf32> to vector<32x16xbf16>
    %c0_7 = arith.constant 0 : index
    %c0_8 = arith.constant 0 : index
    %8 = vector.load %arg4[%c0_7, %c0_8] : memref<16x4xbf16, #tpu.memory_space<vmem>>, vector<16x4xbf16>
    %cst_9 = arith.constant dense<0.000000e+00> : vector<32x4xf32>
    %9 = tpu.matmul %7, %8, %cst_9 {dimension_numbers = #tpu.dot_dimension_numbers<[1], [0], [0], [1], [0, 0, 1, 1], [], []>} : vector<32x16xbf16>, vector<16x4xbf16>, vector<32x4xf32> -> vector<32x4xf32>
    %10 = tpu.transpose %9, [1, 0] : vector<32x4xf32> -> vector<4x32xf32>
    %11 = vector.extract_strided_slice %9 {offsets = [0, 1], sizes = [32, 1], strides = [1, 1]} : vector<32x4xf32> to vector<32x1xf32>
    %12 = vector.extract_strided_slice %10 {offsets = [0, 0], sizes = [1, 32], strides = [1, 1]} : vector<4x32xf32> to vector<1x32xf32>
    %13 = vector.broadcast %11 : vector<32x1xf32> to vector<32x32xf32>
    %14 = vector.broadcast %12 : vector<1x32xf32> to vector<32x32xf32>
    %15 = arith.addf %13, %14 : vector<32x32xf32>
    %cst_10 = arith.constant 0.000000e+00 : f32
    %16 = vector.broadcast %cst_10 : f32 to vector<32x32xf32>
    %17 = arith.cmpf ogt, %15, %16 : vector<32x32xf32>
    %cst_11 = arith.constant 2.000000e-01 : f32
    %18 = vector.broadcast %cst_11 : f32 to vector<32x32xf32>
    %19 = arith.mulf %18, %15 : vector<32x32xf32>
    %20 = arith.select %17, %15, %19 : vector<32x32xi1>, vector<32x32xf32>
    %21 = arith.addf %20, %1 : vector<32x32xf32>
    %cst_12 = arith.constant dense<0xFF800000> : vector<32xf32>
    %22 = vector.multi_reduction <maximumf>, %21, %cst_12 [1] : vector<32x32xf32> to vector<32xf32>
    %23 = vector.shape_cast %22 : vector<32xf32> to vector<32x1xf32>
    %24 = vector.broadcast %23 : vector<32x1xf32> to vector<32x32xf32>
    %25 = arith.subf %21, %24 : vector<32x32xf32>
    %26 = math.exp %25 : vector<32x32xf32>
    %cst_13 = arith.constant dense<0.000000e+00> : vector<32xf32>
    %27 = vector.multi_reduction <add>, %26, %cst_13 [1] : vector<32x32xf32> to vector<32xf32>
    %28 = vector.shape_cast %27 : vector<32xf32> to vector<32x1xf32>
    %29 = tpu.reciprocal %28 : vector<32x1xf32> -> vector<32x1xf32>
    %30 = vector.broadcast %29 : vector<32x1xf32> to vector<32x32xf32>
    %31 = arith.mulf %26, %30 : vector<32x32xf32>
    %32 = arith.truncf %31 : vector<32x32xf32> to vector<32x32xbf16>
    %33 = vector.extract_strided_slice %7 {offsets = [0, 0], sizes = [32, 8], strides = [1, 1]} : vector<32x16xbf16> to vector<32x8xbf16>
    %cst_14 = arith.constant dense<0.000000e+00> : vector<32x8xf32>
    %34 = tpu.matmul %32, %33, %cst_14 {dimension_numbers = #tpu.dot_dimension_numbers<[1], [0], [0], [1], [0, 0, 1, 1], [], []>} : vector<32x32xbf16>, vector<32x8xbf16>, vector<32x8xf32> -> vector<32x8xf32>
    %35 = vector.extract_strided_slice %9 {offsets = [0, 3], sizes = [32, 1], strides = [1, 1]} : vector<32x4xf32> to vector<32x1xf32>
    %36 = vector.extract_strided_slice %10 {offsets = [2, 0], sizes = [1, 32], strides = [1, 1]} : vector<4x32xf32> to vector<1x32xf32>
    %37 = vector.broadcast %35 : vector<32x1xf32> to vector<32x32xf32>
    %38 = vector.broadcast %36 : vector<1x32xf32> to vector<32x32xf32>
    %39 = arith.addf %37, %38 : vector<32x32xf32>
    %cst_15 = arith.constant 0.000000e+00 : f32
    %40 = vector.broadcast %cst_15 : f32 to vector<32x32xf32>
    %41 = arith.cmpf ogt, %39, %40 : vector<32x32xf32>
    %cst_16 = arith.constant 2.000000e-01 : f32
    %42 = vector.broadcast %cst_16 : f32 to vector<32x32xf32>
    %43 = arith.mulf %42, %39 : vector<32x32xf32>
    %44 = arith.select %41, %39, %43 : vector<32x32xi1>, vector<32x32xf32>
    %45 = arith.addf %44, %1 : vector<32x32xf32>
    %cst_17 = arith.constant dense<0xFF800000> : vector<32xf32>
    %46 = vector.multi_reduction <maximumf>, %45, %cst_17 [1] : vector<32x32xf32> to vector<32xf32>
    %47 = vector.shape_cast %46 : vector<32xf32> to vector<32x1xf32>
    %48 = vector.broadcast %47 : vector<32x1xf32> to vector<32x32xf32>
    %49 = arith.subf %45, %48 : vector<32x32xf32>
    %50 = math.exp %49 : vector<32x32xf32>
    %cst_18 = arith.constant dense<0.000000e+00> : vector<32xf32>
    %51 = vector.multi_reduction <add>, %50, %cst_18 [1] : vector<32x32xf32> to vector<32xf32>
    %52 = vector.shape_cast %51 : vector<32xf32> to vector<32x1xf32>
    %53 = tpu.reciprocal %52 : vector<32x1xf32> -> vector<32x1xf32>
    %54 = vector.broadcast %53 : vector<32x1xf32> to vector<32x32xf32>
    %55 = arith.mulf %50, %54 : vector<32x32xf32>
    %56 = arith.truncf %55 : vector<32x32xf32> to vector<32x32xbf16>
    %57 = vector.extract_strided_slice %7 {offsets = [0, 8], sizes = [32, 8], strides = [1, 1]} : vector<32x16xbf16> to vector<32x8xbf16>
    %cst_19 = arith.constant dense<0.000000e+00> : vector<32x8xf32>
    %58 = tpu.matmul %56, %57, %cst_19 {dimension_numbers = #tpu.dot_dimension_numbers<[1], [0], [0], [1], [0, 0, 1, 1], [], []>} : vector<32x32xbf16>, vector<32x8xbf16>, vector<32x8xf32> -> vector<32x8xf32>
    %59 = tpu.concatenate %34, %58 in 1 : vector<32x8xf32>, vector<32x8xf32> -> vector<32x16xf32>
    %c0_20 = arith.constant 0 : index
    %c0_21 = arith.constant 0 : index
    %60 = vector.load %arg5[%c0_20, %c0_21] : memref<1x16xf32, #tpu.memory_space<vmem>>, vector<1x16xf32>
    %61 = vector.broadcast %60 : vector<1x16xf32> to vector<32x16xf32>
    %62 = arith.addf %59, %61 : vector<32x16xf32>
    %63 = arith.truncf %62 : vector<32x16xf32> to vector<32x16xbf16>
    %c0_22 = arith.constant 0 : index
    %c0_23 = arith.constant 0 : index
    %64 = vector.load %arg6[%c0_22, %c0_23] : memref<16x16xbf16, #tpu.memory_space<vmem>>, vector<16x16xbf16>
    %cst_24 = arith.constant dense<0.000000e+00> : vector<32x16xf32>
    %65 = tpu.matmul %63, %64, %cst_24 {dimension_numbers = #tpu.dot_dimension_numbers<[1], [0], [0], [1], [0, 0, 1, 1], [], []>} : vector<32x16xbf16>, vector<16x16xbf16>, vector<32x16xf32> -> vector<32x16xf32>
    %66 = arith.truncf %65 : vector<32x16xf32> to vector<32x16xbf16>
    %c0_25 = arith.constant 0 : index
    %c0_26 = arith.constant 0 : index
    %67 = vector.load %arg7[%c0_25, %c0_26] : memref<16x4xbf16, #tpu.memory_space<vmem>>, vector<16x4xbf16>
    %cst_27 = arith.constant dense<0.000000e+00> : vector<32x4xf32>
    %68 = tpu.matmul %66, %67, %cst_27 {dimension_numbers = #tpu.dot_dimension_numbers<[1], [0], [0], [1], [0, 0, 1, 1], [], []>} : vector<32x16xbf16>, vector<16x4xbf16>, vector<32x4xf32> -> vector<32x4xf32>
    %69 = tpu.transpose %68, [1, 0] : vector<32x4xf32> -> vector<4x32xf32>
    %70 = vector.extract_strided_slice %68 {offsets = [0, 1], sizes = [32, 1], strides = [1, 1]} : vector<32x4xf32> to vector<32x1xf32>
    %71 = vector.extract_strided_slice %69 {offsets = [0, 0], sizes = [1, 32], strides = [1, 1]} : vector<4x32xf32> to vector<1x32xf32>
    %72 = vector.broadcast %70 : vector<32x1xf32> to vector<32x32xf32>
    %73 = vector.broadcast %71 : vector<1x32xf32> to vector<32x32xf32>
    %74 = arith.addf %72, %73 : vector<32x32xf32>
    %cst_28 = arith.constant 0.000000e+00 : f32
    %75 = vector.broadcast %cst_28 : f32 to vector<32x32xf32>
    %76 = arith.cmpf ogt, %74, %75 : vector<32x32xf32>
    %cst_29 = arith.constant 2.000000e-01 : f32
    %77 = vector.broadcast %cst_29 : f32 to vector<32x32xf32>
    %78 = arith.mulf %77, %74 : vector<32x32xf32>
    %79 = arith.select %76, %74, %78 : vector<32x32xi1>, vector<32x32xf32>
    %80 = arith.addf %79, %1 : vector<32x32xf32>
    %cst_30 = arith.constant dense<0xFF800000> : vector<32xf32>
    %81 = vector.multi_reduction <maximumf>, %80, %cst_30 [1] : vector<32x32xf32> to vector<32xf32>
    %82 = vector.shape_cast %81 : vector<32xf32> to vector<32x1xf32>
    %83 = vector.broadcast %82 : vector<32x1xf32> to vector<32x32xf32>
    %84 = arith.subf %80, %83 : vector<32x32xf32>
    %85 = math.exp %84 : vector<32x32xf32>
    %cst_31 = arith.constant dense<0.000000e+00> : vector<32xf32>
    %86 = vector.multi_reduction <add>, %85, %cst_31 [1] : vector<32x32xf32> to vector<32xf32>
    %87 = vector.shape_cast %86 : vector<32xf32> to vector<32x1xf32>
    %88 = tpu.reciprocal %87 : vector<32x1xf32> -> vector<32x1xf32>
    %89 = vector.broadcast %88 : vector<32x1xf32> to vector<32x32xf32>
    %90 = arith.mulf %85, %89 : vector<32x32xf32>
    %91 = arith.truncf %90 : vector<32x32xf32> to vector<32x32xbf16>
    %92 = vector.extract_strided_slice %66 {offsets = [0, 0], sizes = [32, 8], strides = [1, 1]} : vector<32x16xbf16> to vector<32x8xbf16>
    %cst_32 = arith.constant dense<0.000000e+00> : vector<32x8xf32>
    %93 = tpu.matmul %91, %92, %cst_32 {dimension_numbers = #tpu.dot_dimension_numbers<[1], [0], [0], [1], [0, 0, 1, 1], [], []>} : vector<32x32xbf16>, vector<32x8xbf16>, vector<32x8xf32> -> vector<32x8xf32>
    %94 = vector.extract_strided_slice %68 {offsets = [0, 3], sizes = [32, 1], strides = [1, 1]} : vector<32x4xf32> to vector<32x1xf32>
    %95 = vector.extract_strided_slice %69 {offsets = [2, 0], sizes = [1, 32], strides = [1, 1]} : vector<4x32xf32> to vector<1x32xf32>
    %96 = vector.broadcast %94 : vector<32x1xf32> to vector<32x32xf32>
    %97 = vector.broadcast %95 : vector<1x32xf32> to vector<32x32xf32>
    %98 = arith.addf %96, %97 : vector<32x32xf32>
    %cst_33 = arith.constant 0.000000e+00 : f32
    %99 = vector.broadcast %cst_33 : f32 to vector<32x32xf32>
    %100 = arith.cmpf ogt, %98, %99 : vector<32x32xf32>
    %cst_34 = arith.constant 2.000000e-01 : f32
    %101 = vector.broadcast %cst_34 : f32 to vector<32x32xf32>
    %102 = arith.mulf %101, %98 : vector<32x32xf32>
    %103 = arith.select %100, %98, %102 : vector<32x32xi1>, vector<32x32xf32>
    %104 = arith.addf %103, %1 : vector<32x32xf32>
    %cst_35 = arith.constant dense<0xFF800000> : vector<32xf32>
    %105 = vector.multi_reduction <maximumf>, %104, %cst_35 [1] : vector<32x32xf32> to vector<32xf32>
    %106 = vector.shape_cast %105 : vector<32xf32> to vector<32x1xf32>
    %107 = vector.broadcast %106 : vector<32x1xf32> to vector<32x32xf32>
    %108 = arith.subf %104, %107 : vector<32x32xf32>
    %109 = math.exp %108 : vector<32x32xf32>
    %cst_36 = arith.constant dense<0.000000e+00> : vector<32xf32>
    %110 = vector.multi_reduction <add>, %109, %cst_36 [1] : vector<32x32xf32> to vector<32xf32>
    %111 = vector.shape_cast %110 : vector<32xf32> to vector<32x1xf32>
    %112 = tpu.reciprocal %111 : vector<32x1xf32> -> vector<32x1xf32>
    %113 = vector.broadcast %112 : vector<32x1xf32> to vector<32x32xf32>
    %114 = arith.mulf %109, %113 : vector<32x32xf32>
    %115 = arith.truncf %114 : vector<32x32xf32> to vector<32x32xbf16>
    %116 = vector.extract_strided_slice %66 {offsets = [0, 8], sizes = [32, 8], strides = [1, 1]} : vector<32x16xbf16> to vector<32x8xbf16>
    %cst_37 = arith.constant dense<0.000000e+00> : vector<32x8xf32>
    %117 = tpu.matmul %115, %116, %cst_37 {dimension_numbers = #tpu.dot_dimension_numbers<[1], [0], [0], [1], [0, 0, 1, 1], [], []>} : vector<32x32xbf16>, vector<32x8xbf16>, vector<32x8xf32> -> vector<32x8xf32>
    %118 = tpu.concatenate %93, %117 in 1 : vector<32x8xf32>, vector<32x8xf32> -> vector<32x16xf32>
    %c0_38 = arith.constant 0 : index
    %c0_39 = arith.constant 0 : index
    %119 = vector.load %arg8[%c0_38, %c0_39] : memref<1x16xf32, #tpu.memory_space<vmem>>, vector<1x16xf32>
    %120 = vector.broadcast %119 : vector<1x16xf32> to vector<32x16xf32>
    %121 = arith.addf %118, %120 : vector<32x16xf32>
    %122 = arith.addf %62, %121 : vector<32x16xf32>
    %123 = tpu.transpose %122, [1, 0] : vector<32x16xf32> -> vector<16x32xf32>
    %c0_40 = arith.constant 0 : index
    %c0_41 = arith.constant 0 : index
    %124 = vector.load %arg9[%c0_40, %c0_41] : memref<32x16xbf16, #tpu.memory_space<vmem>>, vector<32x16xbf16>
    %125 = arith.truncf %123 : vector<16x32xf32> to vector<16x32xbf16>
    %cst_42 = arith.constant dense<0.000000e+00> : vector<32x32xf32>
    %126 = tpu.matmul %124, %125, %cst_42 {dimension_numbers = #tpu.dot_dimension_numbers<[1], [0], [0], [1], [0, 0, 1, 1], [], []>} : vector<32x16xbf16>, vector<16x32xbf16>, vector<32x32xf32> -> vector<32x32xf32>
    %c0_43 = arith.constant 0 : index
    %c0_44 = arith.constant 0 : index
    %c0_45 = arith.constant 0 : index
    %127 = vector.load %arg10[%c0_43, %c0_44, %c0_45] : memref<1x32x32xf32, #tpu.memory_space<vmem>>, vector<1x32x32xf32>
    %128 = vector.shape_cast %127 : vector<1x32x32xf32> to vector<32x32xf32>
    %129 = vector.shape_cast %126 : vector<32x32xf32> to vector<1x32x32xf32>
    tpu.vector_store %arg10[%c0_43, %c0_44, %c0_45], %129 {strides = array<i32>} : memref<1x32x32xf32, #tpu.memory_space<vmem>>, vector<1x32x32xf32>,
    return
  }
  func.func @transform_0(%arg0: i32) -> (i32, i32, i32) {
    %c0_i32 = arith.constant 0 : i32
    %c0_i32_0 = arith.constant 0 : i32
    %c0_i32_1 = arith.constant 0 : i32
    return %arg0, %c0_i32, %c0_i32_0 : i32, i32, i32
  }
  func.func @transform_1(%arg0: i32) -> (i32, i32, i32) {
    %c0_i32 = arith.constant 0 : i32
    %c0_i32_0 = arith.constant 0 : i32
    %c0_i32_1 = arith.constant 0 : i32
    return %arg0, %c0_i32, %c0_i32_0 : i32, i32, i32
  }
  func.func @transform_2(%arg0: i32) -> (i32, i32) {
    %c0_i32 = arith.constant 0 : i32
    %c0_i32_0 = arith.constant 0 : i32
    %c0_i32_1 = arith.constant 0 : i32
    return %c0_i32, %c0_i32_0 : i32, i32
  }
  func.func @transform_3(%arg0: i32) -> (i32, i32) {
    %c0_i32 = arith.constant 0 : i32
    %c0_i32_0 = arith.constant 0 : i32
    %c0_i32_1 = arith.constant 0 : i32
    return %c0_i32, %c0_i32_0 : i32, i32
  }
  func.func @transform_4(%arg0: i32) -> (i32, i32) {
    %c0_i32 = arith.constant 0 : i32
    %c0_i32_0 = arith.constant 0 : i32
    %c0_i32_1 = arith.constant 0 : i32
    return %c0_i32, %c0_i32_0 : i32, i32
  }
  func.func @transform_5(%arg0: i32) -> (i32, i32) {
    %c0_i32 = arith.constant 0 : i32
    %c0_i32_0 = arith.constant 0 : i32
    %c0_i32_1 = arith.constant 0 : i32
    return %c0_i32, %c0_i32_0 : i32, i32
  }
  func.func @transform_6(%arg0: i32) -> (i32, i32) {
    %c0_i32 = arith.constant 0 : i32
    %c0_i32_0 = arith.constant 0 : i32
    %c0_i32_1 = arith.constant 0 : i32
    return %c0_i32, %c0_i32_0 : i32, i32
  }
  func.func @transform_7(%arg0: i32) -> (i32, i32) {
    %c0_i32 = arith.constant 0 : i32
    %c0_i32_0 = arith.constant 0 : i32
    %c0_i32_1 = arith.constant 0 : i32
    return %c0_i32, %c0_i32_0 : i32, i32
  }
  func.func @transform_8(%arg0: i32) -> (i32, i32) {
    %c0_i32 = arith.constant 0 : i32
    %c0_i32_0 = arith.constant 0 : i32
    %c0_i32_1 = arith.constant 0 : i32
    return %c0_i32, %c0_i32_0 : i32, i32
  }
  func.func @transform_9(%arg0: i32) -> (i32, i32, i32) {
    %c0_i32 = arith.constant 0 : i32
    %c0_i32_0 = arith.constant 0 : i32
    %c0_i32_1 = arith.constant 0 : i32
    return %arg0, %c0_i32, %c0_i32_0 : i32, i32, i32
  }
}

</mosaic_0001>

<bundles_post_ra>
// kernel: tpu_custom_call.1
= control target key start
LH: loop header
LB: loop body
LE: loop exit
PB: predicated region body
PF: predicated region fallthrough
CT: control target
= control target key end

     0   :  { %vm52_vm0 = vcmask 130048   ;;  %s1636_s0 = inlined_call_operand.vmem [shape: f32[1,32,16], index: 0, kind: input, shape index: {}]   ;;  %s1637_s1 = inlined_call_operand.vmem [shape: f32[1,32,32], index: 1, kind: input, shape index: {}]   ;;  %s1638_s2 = inlined_call_operand.vmem [shape: bf16[16,16], index: 2, kind: input, shape index: {}]   ;;  %s1639_s3 = inlined_call_operand.vmem [shape: bf16[16,4], index: 3, kind: input, shape index: {}]   ;;  %s1640_s4 = inlined_call_operand.vmem [shape: f32[1,16], index: 4, kind: input, shape index: {}]   ;;  %s1641_s5 = inlined_call_operand.vmem [shape: bf16[16,16], index: 5, kind: input, shape index: {}]   ;;  %s1642_s6 = inlined_call_operand.vmem [shape: bf16[16,4], index: 6, kind: input, shape index: {}]   ;;  %s1643_s7 = inlined_call_operand.vmem [shape: f32[1,16], index: 7, kind: input, shape index: {}]   ;;  %s1644_s8 = inlined_call_operand.vmem [shape: bf16[32,16], index: 8, kind: input, shape index: {}]   ;;  %s1645_s9 = inlined_call_operand.hbm [shape: f32[1,32,32], index: 9, kind: output, shape index: {}]  }
   0x1   :  { %v1276_v0 = vld [vmem:[%s1638_s2] sm:$0xff]   ;;  %v39_v2 = vld [vmem:[%s1636_s0 + $0x8] sm:$0xff]  ;;  %v40_v3 = vld [vmem:[%s1636_s0 + $0x10] sm:$0xff] }
   0x2   :  { %v38_v1 = vld [vmem:[%s1636_s0] sm:$0xff]  ;;  %1202 = vmatprep.subr.bf16.mxu0 %v1276_v0  ;;  %v41_v5 = vld [vmem:[%s1636_s0 + $0x18] sm:$0xff] }
   0x3   :  { %v42_v4 = vpack.c.bf16 %v39_v2, %v38_v1  ;;  %1203 = vmatpush3.bf16.msra.mxu0 %v1276_v0  ;;  %v43_v6 = vpack.c.bf16 %v41_v5, %v40_v3 }
   0x5   :  { %1204 = vmatprep.mubr.msk.bf16.mxu0 %vm52_vm0, %v42_v4 }
   0x6   :  { %14 = vsyncpa [#allocation3], 0  ;;  %1205 = vmatmul.mubr.msk.bf16.vlgmr.msra.gmra.mxu0 %vm52_vm0, %v43_v6  ;;  %v1277_v7 = vld [vmem:[%s1639_s3] sm:$0xff]   ;;  %v1368_v8 = vmov 3   ;;  %v1369_v19 = vmov 1   ;;  %v225_v21 = vlaneseq  ;;  %v1468_v37 = vld [vmem:[%s1637_s1 + $0x8] sm:$0xff] }
   0x7   :  { %1208 = vmatprep.subr.bf16.mxu1 %v1277_v7  ;;  %1271 = vset.pattern.permute.xlu1 %v1368_v8  ;;  %v1473_v38 = vld [vmem:[%s1637_s1] sm:$0xff]  ;;  %vm249_vm3 = vcmask 261120   ;;  %v1478_v44 = vld [vmem:[%s1637_s1 + $0x10] sm:$0xff]  ;;  %v1488_v54 = vld [vmem:[%s1637_s1 + $0x18] sm:$0xff]  ;;  %s1370_s1 = smov 120   ;;  %s1371_s28 = smov 8  }
   0x8   :  { %1209 = vmatpush3.bf16.msra.mxu1 %v1277_v7  ;;  %1272 = vset.pattern.permute.xlu0 %v1368_v8  ;;  %v1457_v24 = vshrl.u32 %v225_v21, 7  ;;  %vm516_vm10 = vcmask 64512   ;;  %s1372_s14 = smov [#allocation2]  }
   0x9   :  { %s1134_s15 = sshll.u32 %s1372_s14, 4  ;;  %s1135_s15 = int_to_ptr.vmem [resolvable:$true] %s1134_s15 }
   0xa   :  { %v369_v27 = vsub.s32 2, %v1457_v24  ;;  %v227_v28 = vsub.s32 0, %v1457_v24  ;;  %s1346_s16 = scalar_lea.vmem %s1135_s15, 512  ;;  %p1351_p1 = scmp.lt.s32.totalorder %s1135_s15, %s1135_s15 }
   0xb   :  { %p1347_p0 = scmp.ne.s32.totalorder %s1135_s15, %s1346_s16  ;;  %p1352_p2 = scmp.lt.s32.totalorder %s1346_s16, %s1346_s16 }
   0xd   :  { %p1353_p3 = por %p1352_p2, %p1351_p1 }
   0xf   :  { %p1354_p4 = pnand %p1353_p3, %p1347_p0 }
  0xc6   :  { %v1206_v9 = vpop.f32.mrf.mxu0 }
  0xc8   :  { %v93_v10 = vpop.f32.mrf.mxu0 }
  0xca   :  { %v1207_v11 = vpop.f32.mrf.mxu0 }
  0xcb   :  { %v1444_v12 = vpack.c.bf16 %v1207_v11, %v1206_v9 }
  0xcc   :  { %v96_v13 = vpop.f32.mrf.mxu0 }
  0xcd   :  { %v1446_v14 = vpack.c.bf16 %v96_v13, %v93_v10  ;;  %1214 = vmatprep.subr.bf16.mxu0 %v1444_v12 }
  0xce   :  { %1215 = vmatpush3.bf16.msra.mxu0 %v1444_v12 }
  0xcf   :  { %1210 = vmatprep.mubr.msk.bf16.mxu1 %vm52_vm0, %v1446_v14  ;;  %1216 = vmatprep.subr.bf16.mxu0 %v1446_v14 }
  0xd0   :  { %1211 = vmatmul.mubr.msk.bf16.vlgmr.msra.gmra.mxu1 %vm52_vm0, %v1444_v12 }
  0xd2   :  { %1217 = vmatpush3.bf16.msra.mxu0 %v1446_v14 }
 0x190   :  { %v1212_v15 = vpop.f32.mrf.mxu1 }
 0x191   :  { %360 = vperm.xlu1 %1271, %v1212_v15  }
 0x192   :  { %v158_v16 = vpop.f32.mrf.mxu1 }
 0x193   :  { %352 = vperm.xlu0 %1272, %v158_v16  }
 0x194   :  { %v1213_v17 = vpop.f32.mrf.mxu1 }
 0x195   :  { %364 = vperm.xlu1 %1271, %v1213_v17  }
 0x196   :  { %v161_v18 = vpop.f32.mrf.mxu1 }
 0x197   :  { %356 = vperm.xlu0 %1272, %v161_v18  }
 0x199   :  { %1273 = vset.pattern.permute.xlu1 %v1369_v19 }
 0x19a   :  { %207 = vperm.xlu1 %1273, %v158_v16  }
 0x19e   :  { %217 = vperm.xlu1 %1273, %v1212_v15  }
 0x1a2   :  { %222 = vperm.xlu1 %1273, %v1213_v17  }
 0x1a6   :  { %212 = vperm.xlu1 %1273, %v161_v18  }
 0x1aa   :  { %1274 = vset.pattern.permute.xlu1 %v1368_v8 }
 0x1b5   :  { %173 = vxpose.xlu0.b32.start [1/4] (short) (narrow) %v158_v16, 8 }
 0x1b9   :  { %174 = vxpose.xlu0.b32.cont [2/4] (short) (narrow) %v161_v18, 8 }
 0x1bd   :  { %175 = vxpose.xlu0.b32.cont [3/4] (short) (narrow) %v1212_v15, 8 }
 0x1c1   :  { %176 = vxpose.xlu0.b32.end [4/4] (short) (narrow) %v1213_v17, 8 }
 0x20c   :  { %v361_v20 = vpop.permute.xlu1 %360 }
 0x20e   :  { %v353_v22 = vpop.permute.xlu0 %352 }
 0x210   :  { %v365_v23 = vpop.permute.xlu1 %364 }
 0x212   :  { %v357_v25 = vpop.permute.xlu0 %356 }
 0x215   :  { %v208_v26 = vpop.permute.xlu1 %207 }
 0x219   :  { %v218_v31 = vpop.permute.xlu1 %217 }
 0x21d   :  { %v223_v47 = vpop.permute.xlu1 %222 }
 0x221   :  { %v213_v58 = vpop.permute.xlu1 %212 }
 0x231   :  { %v189_v29 = vpop.trf.xlu0 }
 0x232   :  { %v370_v30 = vrot.slane %v189_v29, %v369_v27  ;;  %v228_v32 = vrot.slane %v189_v29, %v227_v28 }
 0x234   :  { %v372_v33 = vadd.f32 %v370_v30, %v357_v25  ;;  %v371_v34 = vadd.f32 %v370_v30, %v353_v22  ;;  %v373_v35 = vadd.f32 %v370_v30, %v361_v20  ;;  %v374_v36 = vadd.f32 %v370_v30, %v365_v23 }
 0x235   :  { %v229_v46 = vadd.f32 %v228_v32, %v208_v26  ;;  %v231_v57 = vadd.f32 %v228_v32, %v218_v31  ;;  %v230_v63 = vadd.f32 %v228_v32, %v213_v58  ;;  %v232_v4 = vadd.f32 %v228_v32, %v223_v47 }
 0x236   :  { %vm376_vm1 = vcmp.gt.f32.partialorder %v372_v33, 0.0  ;;  %v380_v39 = vmul.f32 0.2, %v372_v33  ;;  %vm375_vm2 = vcmp.gt.f32.partialorder %v371_v34, 0.0  ;;  %v379_v40 = vmul.f32 0.2, %v371_v34 }
 0x237   :  { %vm377_vm4 = vcmp.gt.f32.partialorder %v373_v35, 0.0  ;;  %v381_v41 = vmul.f32 0.2, %v373_v35  ;;  %v382_v45 = vmul.f32 0.2, %v374_v36  ;;  %vm378_vm5 = vcmp.gt.f32.partialorder %v374_v36, 0.0 }
 0x238   :  { %v384_v42 = vsel %vm376_vm1, %v372_v33, %v380_v39  ;;  %v383_v43 = vsel %vm375_vm2, %v371_v34, %v379_v40  ;;  %v237_v56 = vmul.f32 0.2, %v229_v46  ;;  %vm233_vm6 = vcmp.gt.f32.partialorder %v229_v46, 0.0 }
 0x239   :  { %v388_v48 = vadd.f32 %v384_v42, %v1468_v37  ;;  %v387_v49 = vadd.f32 %v383_v43, %v1473_v38  ;;  %v385_v50 = vsel %vm377_vm4, %v373_v35, %v381_v41  ;;  %v386_v55 = vsel %vm378_vm5, %v374_v36, %v382_v45 }
 0x23a   :  { %v389_v53 = vadd.f32 %v385_v50, %v1478_v44  ;;  %v390_v60 = vadd.f32 %v386_v55, %v1488_v54  ;;  %v241_v61 = vsel %vm233_vm6, %v229_v46, %v237_v56  ;;  %v239_v62 = vmul.f32 0.2, %v231_v57 }
 0x23b   :  { %v394_v51 = vsel %vm249_vm3, %v388_v48, -inf  ;;  %v391_v52 = vsel %vm249_vm3, %v387_v49, -inf  ;;  %vm235_vm7 = vcmp.gt.f32.partialorder %v231_v57, 0.0  ;;  %v245_v1 = vadd.f32 %v241_v61, %v1473_v38 }
 0x23c   :  { %395 = vmax.xlane.f32.xlu0 %v394_v51  ;;  %392 = vmax.xlane.f32.xlu1 %v391_v52  ;;  %v397_v59 = vsel %vm249_vm3, %v389_v53, -inf  ;;  %v400_v0 = vsel %vm249_vm3, %v390_v60, -inf  ;;  %v243_v2 = vsel %vm235_vm7, %v231_v57, %v239_v62  ;;  %v238_v3 = vmul.f32 0.2, %v230_v63 }
 0x23d   :  { %vm234_vm8 = vcmp.gt.f32.partialorder %v230_v63, 0.0  ;;  %v250_v5 = vsel %vm249_vm3, %v245_v1, -inf  ;;  %v247_v6 = vadd.f32 %v243_v2, %v1478_v44  ;;  %v240_v8 = vmul.f32 0.2, %v232_v4 }
 0x23e   :  { %v242_v7 = vsel %vm234_vm8, %v230_v63, %v238_v3  ;;  %vm236_vm9 = vcmp.gt.f32.partialorder %v232_v4, 0.0 }
 0x23f   :  { %v256_v9 = vsel %vm249_vm3, %v247_v6, -inf  ;;  %v246_v10 = vadd.f32 %v242_v7, %v1468_v37  ;;  %v244_v11 = vsel %vm236_vm9, %v232_v4, %v240_v8 }
 0x240   :  { %398 = vmax.xlane.f32.xlu1 %v397_v59  ;;  %v248_v15 = vadd.f32 %v244_v11, %v1488_v54 }
 0x241   :  { %v253_v13 = vsel %vm249_vm3, %v246_v10, -inf }
 0x242   :  { %v259_v16 = vsel %vm249_vm3, %v248_v15, -inf }
 0x244   :  { %401 = vmax.xlane.f32.xlu1 %v400_v0 }
 0x248   :  { %251 = vmax.xlane.f32.xlu1 %v250_v5 }
 0x24c   :  { %257 = vmax.xlane.f32.xlu1 %v256_v9 }
 0x250   :  { %254 = vmax.xlane.f32.xlu1 %v253_v13 }
 0x254   :  { %260 = vmax.xlane.f32.xlu1 %v259_v16 }
 0x2c5   :  { %v393_v17 = vpop.xlane.xlu1 %392  ;;  %v396_v20 = vpop.xlane.xlu0 %395 }
 0x2c6   :  { %v403_v18 = vsub.f32 %v387_v49, %v393_v17  ;;  %v404_v23 = vsub.f32 %v388_v48, %v396_v20 }
 0x2c8   :  { %v407_v25 = vmul.f32 1.442695, %v403_v18  ;;  %v409_v31 = vmul.f32 1.442695, %v404_v23 }
 0x2c9   :  { %v399_v21 = vpop.xlane.xlu1 %398 }
 0x2ca   :  { %v405_v22 = vsub.f32 %v389_v53, %v399_v21 }
 0x2cc   :  { %v411_v26 = vmul.f32 1.442695, %v405_v22 }
 0x2cd   :  { %v402_v29 = vpop.xlane.xlu1 %401 }
 0x2ce   :  { %1282 = vpow2.f32 %v411_v26  ;;  %v406_v30 = vsub.f32 %v390_v60, %v402_v29 }
 0x2cf   :  { %1284 = vpow2.f32 %v407_v25 }
 0x2d0   :  { %v413_v32 = vmul.f32 1.442695, %v406_v30 }
 0x2d1   :  { %v252_v43 = vpop.xlane.xlu1 %251 }
 0x2d2   :  { %1286 = vpow2.f32 %v413_v32  ;;  %v262_v49 = vsub.f32 %v245_v1, %v252_v43 }
 0x2d3   :  { %1288 = vpow2.f32 %v409_v31 }
 0x2d4   :  { %v266_v52 = vmul.f32 1.442695, %v262_v49 }
 0x2d5   :  { %v258_v45 = vpop.xlane.xlu1 %257 }
 0x2d6   :  { %v264_v53 = vsub.f32 %v247_v6, %v258_v45 }
 0x2d8   :  { %v270_v56 = vmul.f32 1.442695, %v264_v53 }
 0x2d9   :  { %v255_v46 = vpop.xlane.xlu1 %254 }
 0x2da   :  { %v263_v47 = vsub.f32 %v246_v10, %v255_v46 }
 0x2db   :  { %v1501_v33 = vpop.eup %1282 }
 0x2dc   :  { %v421_v34 = vsel %vm249_vm3, %v1501_v33, 0.0  ;;  %v1285_v35 = vpop.eup %1284  ;;  %v268_v50 = vmul.f32 1.442695, %v263_v47 }
 0x2dd   :  { %422 = vadd.xlane.f32.xlu1 %v421_v34  ;;  %v415_v40 = vsel %vm249_vm3, %v1285_v35, 0.0  ;;  %v261_v48 = vpop.xlane.xlu1 %260 }
 0x2de   :  { %v265_v51 = vsub.f32 %v248_v15, %v261_v48  ;;  %1290 = vpow2.f32 %v268_v50  ;;  %v1155_v48 = vld [vmem:[%s1640_s4] ss:$0 sm:$0xff] }
 0x2df   :  { %v1287_v36 = vpop.eup %1286  ;;  %1292 = vpow2.f32 %v266_v52 }
 0x2e0   :  { %v424_v39 = vsel %vm249_vm3, %v1287_v36, 0.0  ;;  %v1289_v41 = vpop.eup %1288  ;;  %v272_v55 = vmul.f32 1.442695, %v265_v51 }
 0x2e1   :  { %425 = vadd.xlane.f32.xlu0 %v424_v39  ;;  %416 = vadd.xlane.f32.xlu1 %v415_v40  ;;  %v418_v42 = vsel %vm249_vm3, %v1289_v41, 0.0 }
 0x2e2   :  { %1294 = vpow2.f32 %v272_v55 }
 0x2e3   :  { %1296 = vpow2.f32 %v270_v56 }
 0x2e5   :  { %419 = vadd.xlane.f32.xlu1 %v418_v42 }
 0x2eb   :  { %v1291_v57 = vpop.eup %1290 }
 0x2ec   :  { %v1293_v58 = vpop.eup %1292 }
 0x2ef   :  { %v1295_v59 = vpop.eup %1294 }
 0x2f0   :  { %v283_v60 = vsel %vm249_vm3, %v1295_v59, 0.0  ;;  %v1297_v61 = vpop.eup %1296 }
 0x2f1   :  { %v280_v62 = vsel %vm249_vm3, %v1297_v61, 0.0 }
 0x2f6   :  { %441 = vrot.lane.b32.xlu1 %v1444_v12, %s1370_s1  ;;  %v277_v12 = vsel %vm249_vm3, %v1291_v57, 0.0 }
 0x2f7   :  { %439 = vrot.lane.b32.xlu0 %v1446_v14, %s1370_s1  ;;  %v274_v14 = vsel %vm249_vm3, %v1293_v58, 0.0 }
 0x316   :  { %278 = vadd.xlane.f32.xlu0 %v277_v12 }
 0x31a   :  { %275 = vadd.xlane.f32.xlu1 %v274_v14  ;;  %284 = vadd.xlane.f32.xlu0 %v283_v60 }
 0x31e   :  { %281 = vadd.xlane.f32.xlu1 %v280_v62 }
 0x366   :  { %v423_v63 = vpop.xlane.xlu1 %422 }
 0x36a   :  { %v426_v0 = vpop.xlane.xlu0 %425  ;;  %v417_v1 = vpop.xlane.xlu1 %416 }
 0x36b   :  { %1298 = vrcp.f32 %v426_v0 }
 0x36c   :  { %1300 = vrcp.f32 %v417_v1 }
 0x36d   :  { %1302 = vrcp.f32 %v423_v63 }
 0x36e   :  { %v420_v2 = vpop.xlane.xlu1 %419  ;;  %v440_v4 = vpop.permute.xlu0 %439 }
 0x36f   :  { %1304 = vrcp.f32 %v420_v2 }
 0x372   :  { %v442_v3 = vpop.permute.xlu1 %441 }
 0x373   :  { %1222 = vmatprep.subr.bf16.mxu1 %v442_v3 }
 0x374   :  { %1223 = vmatpush3.bf16.msra.mxu1 %v442_v3 }
 0x375   :  { %1224 = vmatprep.subr.bf16.mxu1 %v440_v4 }
 0x378   :  { %1225 = vmatpush3.bf16.msra.mxu1 %v440_v4  ;;  %v1299_v5 = vpop.eup %1298 }
 0x379   :  { %v1301_v6 = vpop.eup %1300  ;;  %v434_v9 = vmul.f32 %v1299_v5, %v1287_v36  ;;  %v1278_v36 = vld [vmem:[%s1641_s5] sm:$0xff]  }
 0x37a   :  { %v1303_v7 = vpop.eup %1302  ;;  %v431_v10 = vmul.f32 %v1301_v6, %v1285_v35  ;;  %1230 = vmatprep.subr.bf16.mxu0 %v1278_v36 }
 0x37b   :  { %v433_v13 = vmul.f32 %v1303_v7, %v1501_v33 }
 0x37c   :  { %v1305_v8 = vpop.eup %1304 }
 0x37d   :  { %v432_v11 = vmul.f32 %v1305_v8, %v1289_v41  ;;  %v436_v16 = vpack.c.bf16 %v434_v9, %v433_v13 }
 0x37f   :  { %v435_v15 = vpack.c.bf16 %v432_v11, %v431_v10 }
 0x381   :  { %1226 = vmatprep.mubr.msk.bf16.mxu1 %vm249_vm3, %v435_v15 }
 0x382   :  { %1227 = vmatmul.mubr.msk.bf16.vlgmr.msra.gmra.mxu1 %vm249_vm3, %v436_v16 }
 0x39f   :  { %v279_v17 = vpop.xlane.xlu0 %278 }
 0x3a0   :  { %1306 = vrcp.f32 %v279_v17 }
 0x3a3   :  { %v285_v18 = vpop.xlane.xlu0 %284  ;;  %v276_v20 = vpop.xlane.xlu1 %275 }
 0x3a4   :  { %1308 = vrcp.f32 %v276_v20 }
 0x3a5   :  { %1310 = vrcp.f32 %v285_v18 }
 0x3a7   :  { %v282_v21 = vpop.xlane.xlu1 %281 }
 0x3a8   :  { %1312 = vrcp.f32 %v282_v21 }
 0x3ad   :  { %v1307_v22 = vpop.eup %1306 }
 0x3ae   :  { %v291_v29 = vmul.f32 %v1307_v22, %v1291_v57 }
 0x3b1   :  { %v1309_v23 = vpop.eup %1308 }
 0x3b2   :  { %v1311_v25 = vpop.eup %1310  ;;  %v290_v26 = vmul.f32 %v1309_v23, %v1293_v58 }
 0x3b3   :  { %v293_v33 = vmul.f32 %v1311_v25, %v1295_v59 }
 0x3b4   :  { %v294_v31 = vpack.c.bf16 %v291_v29, %v290_v26 }
 0x3b5   :  { %v1313_v30 = vpop.eup %1312 }
 0x3b6   :  { %v292_v32 = vmul.f32 %v1313_v30, %v1297_v61  ;;  %1218 = vmatprep.mubr.msk.bf16.mxu0 %vm249_vm3, %v294_v31  ;;  %v1279_v61 = vld [vmem:[%s1642_s6] sm:$0xff]  }
 0x3b7   :  { %1236 = vmatprep.subr.bf16.mxu1 %v1279_v61 }
 0x3b8   :  { %v295_v34 = vpack.c.bf16 %v293_v33, %v292_v32  ;;  %1237 = vmatpush3.bf16.msra.mxu1 %v1279_v61 }
 0x3ba   :  { %1219 = vmatmul.mubr.msk.bf16.vlgmr.msra.gmra.mxu0 %vm249_vm3, %v295_v34 }
 0x3bb   :  { %1231 = vmatpush3.bf16.msra.mxu0 %v1278_v36 }
 0x442   :  { %v1228_v35 = vpop.f32.mrf.mxu1 }
 0x444   :  { %v485_v39 = vpop.f32.mrf.mxu1 }
 0x445   :  { %504 = vrot.lane.b32.xlu1 %v485_v39, %s1371_s28 }
 0x446   :  { %v1229_v40 = vpop.f32.mrf.mxu1 }
 0x448   :  { %v488_v41 = vpop.f32.mrf.mxu1 }
 0x449   :  { %508 = vrot.lane.b32.xlu1 %v1228_v35, %s1371_s28  ;;  %506 = vrot.lane.b32.xlu0 %v488_v41, %s1371_s28 }
 0x44d   :  { %510 = vrot.lane.b32.xlu1 %v1229_v40, %s1371_s28 }
 0x47a   :  { %v1220_v42 = vpop.f32.mrf.mxu0 }
 0x47c   :  { %v336_v43 = vpop.f32.mrf.mxu0 }
 0x47e   :  { %v1221_v45 = vpop.f32.mrf.mxu0 }
 0x480   :  { %v339_v47 = vpop.f32.mrf.mxu0 }
 0x4b7   :  { %v505_v46 = vpop.permute.xlu1 %504 }
 0x4b8   :  { %v517_v49 = vsel %vm516_vm10, %v336_v43, %v505_v46 }
 0x4b9   :  { %v1533_v53 = vadd.f32 %v1155_v48, %v517_v49 }
 0x4bb   :  { %v507_v50 = vpop.permute.xlu0 %506  ;;  %v509_v51 = vpop.permute.xlu1 %508 }
 0x4bc   :  { %v518_v52 = vsel %vm516_vm10, %v339_v47, %v507_v50  ;;  %v519_v56 = vsel %vm516_vm10, %v1220_v42, %v509_v51 }
 0x4bd   :  { %v1535_v55 = vadd.f32 %v1155_v48, %v518_v52  ;;  %v1541_v59 = vadd.f32 %v1155_v48, %v519_v56 }
 0x4bf   :  { %v532_v57 = vpack.c.bf16 %v1535_v55, %v1533_v53  ;;  %v511_v58 = vpop.permute.xlu1 %510 }
 0x4c0   :  { %v520_v12 = vsel %vm516_vm10, %v1221_v45, %v511_v58 }
 0x4c1   :  { %v1543_v14 = vadd.f32 %v1155_v48, %v520_v12  ;;  %1232 = vmatprep.mubr.msk.bf16.mxu0 %vm52_vm0, %v532_v57 }
 0x4c3   :  { %v533_v60 = vpack.c.bf16 %v1543_v14, %v1541_v59 }
 0x4c5   :  { %1233 = vmatmul.mubr.msk.bf16.vlgmr.msra.gmra.mxu0 %vm52_vm0, %v533_v60 }
 0x585   :  { %v1234_v62 = vpop.f32.mrf.mxu0 }
 0x587   :  { %v582_v63 = vpop.f32.mrf.mxu0 }
 0x589   :  { %v1235_v0 = vpop.f32.mrf.mxu0 }
 0x58a   :  { %v1552_v1 = vpack.c.bf16 %v1235_v0, %v1234_v62 }
 0x58b   :  { %v585_v2 = vpop.f32.mrf.mxu0 }
 0x58c   :  { %v1554_v3 = vpack.c.bf16 %v585_v2, %v582_v63  ;;  %1242 = vmatprep.subr.bf16.mxu0 %v1552_v1 }
 0x58d   :  { %1243 = vmatpush3.bf16.msra.mxu0 %v1552_v1 }
 0x58e   :  { %1238 = vmatprep.mubr.msk.bf16.mxu1 %vm52_vm0, %v1554_v3  ;;  %1244 = vmatprep.subr.bf16.mxu0 %v1554_v3 }
 0x58f   :  { %1239 = vmatmul.mubr.msk.bf16.vlgmr.msra.gmra.mxu1 %vm52_vm0, %v1552_v1 }
 0x591   :  { %1245 = vmatpush3.bf16.msra.mxu0 %v1554_v3 }
 0x64f   :  { %v1240_v4 = vpop.f32.mrf.mxu1 }
 0x650   :  { %848 = vperm.xlu0 %1272, %v1240_v4  }
 0x651   :  { %v647_v5 = vpop.f32.mrf.mxu1 }
 0x653   :  { %v1241_v6 = vpop.f32.mrf.mxu1 }
 0x654   :  { %840 = vperm.xlu0 %1272, %v647_v5  }
 0x655   :  { %v650_v7 = vpop.f32.mrf.mxu1 }
 0x656   :  { %844 = vperm.xlu1 %1274, %v650_v7  }
 0x65a   :  { %852 = vperm.xlu1 %1274, %v1241_v6  }
 0x65e   :  { %1275 = vset.pattern.permute.xlu1 %v1369_v19 }
 0x65f   :  { %696 = vperm.xlu1 %1275, %v647_v5  }
 0x663   :  { %706 = vperm.xlu1 %1275, %v1240_v4  }
 0x667   :  { %711 = vperm.xlu1 %1275, %v1241_v6  }
 0x66b   :  { %701 = vperm.xlu1 %1275, %v650_v7  }
 0x672   :  { %662 = vxpose.xlu0.b32.start [1/4] (short) (narrow) %v647_v5, 8 }
 0x676   :  { %663 = vxpose.xlu0.b32.cont [2/4] (short) (narrow) %v650_v7, 8 }
 0x67a   :  { %664 = vxpose.xlu0.b32.cont [3/4] (short) (narrow) %v1240_v4, 8 }
 0x67e   :  { %665 = vxpose.xlu0.b32.end [4/4] (short) (narrow) %v1241_v6, 8 }
 0x6cb   :  { %v849_v9 = vpop.permute.xlu0 %848 }
 0x6cf   :  { %v841_v11 = vpop.permute.xlu0 %840 }
 0x6d1   :  { %v845_v8 = vpop.permute.xlu1 %844 }
 0x6d5   :  { %v853_v10 = vpop.permute.xlu1 %852 }
 0x6da   :  { %v697_v13 = vpop.permute.xlu1 %696 }
 0x6de   :  { %v707_v17 = vpop.permute.xlu1 %706 }
 0x6e2   :  { %v712_v33 = vpop.permute.xlu1 %711 }
 0x6e6   :  { %v702_v42 = vpop.permute.xlu1 %701 }
 0x6ee   :  { %v678_v15 = vpop.trf.xlu0 }
 0x6ef   :  { %v858_v16 = vrot.slane %v678_v15, %v369_v27  ;;  %v717_v19 = vrot.slane %v678_v15, %v227_v28 }
 0x6f1   :  { %v859_v18 = vadd.f32 %v858_v16, %v841_v11  ;;  %v860_v20 = vadd.f32 %v858_v16, %v845_v8  ;;  %v861_v21 = vadd.f32 %v858_v16, %v849_v9  ;;  %v862_v22 = vadd.f32 %v858_v16, %v853_v10 }
 0x6f2   :  { %v718_v32 = vadd.f32 %v717_v19, %v697_v13  ;;  %v720_v41 = vadd.f32 %v717_v19, %v707_v17  ;;  %v719_v48 = vadd.f32 %v717_v19, %v702_v42  ;;  %v721_v56 = vadd.f32 %v717_v19, %v712_v33 }
 0x6f3   :  { %vm863_vm11 = vcmp.gt.f32.partialorder %v859_v18, 0.0  ;;  %v867_v23 = vmul.f32 0.2, %v859_v18  ;;  %vm864_vm12 = vcmp.gt.f32.partialorder %v860_v20, 0.0  ;;  %v868_v25 = vmul.f32 0.2, %v860_v20 }
 0x6f4   :  { %vm865_vm13 = vcmp.gt.f32.partialorder %v861_v21, 0.0  ;;  %v869_v26 = vmul.f32 0.2, %v861_v21  ;;  %v870_v31 = vmul.f32 0.2, %v862_v22  ;;  %vm866_vm14 = vcmp.gt.f32.partialorder %v862_v22, 0.0 }
 0x6f5   :  { %v871_v29 = vsel %vm863_vm11, %v859_v18, %v867_v23  ;;  %v872_v30 = vsel %vm864_vm12, %v860_v20, %v868_v25  ;;  %v726_v40 = vmul.f32 0.2, %v718_v32  ;;  %vm722_vm15 = vcmp.gt.f32.partialorder %v718_v32, 0.0 }
 0x6f6   :  { %v875_v27 = vadd.f32 %v871_v29, %v1473_v38  ;;  %v876_v24 = vadd.f32 %v872_v30, %v1468_v37  ;;  %v873_v28 = vsel %vm865_vm13, %v861_v21, %v869_v26  ;;  %v874_v39 = vsel %vm866_vm14, %v862_v22, %v870_v31 }
 0x6f7   :  { %v877_v36 = vadd.f32 %v873_v28, %v1478_v44  ;;  %v878_v45 = vadd.f32 %v874_v39, %v1488_v54  ;;  %v730_v46 = vsel %vm722_vm15, %v718_v32, %v726_v40  ;;  %v728_v47 = vmul.f32 0.2, %v720_v41 }
 0x6f8   :  { %v879_v34 = vsel %vm249_vm3, %v875_v27, -inf  ;;  %v882_v35 = vsel %vm249_vm3, %v876_v24, -inf  ;;  %vm724_vm1 = vcmp.gt.f32.partialorder %v720_v41, 0.0  ;;  %v734_v50 = vadd.f32 %v730_v46, %v1473_v38 }
 0x6f9   :  { %880 = vmax.xlane.f32.xlu1 %v879_v34  ;;  %883 = vmax.xlane.f32.xlu0 %v882_v35  ;;  %v885_v43 = vsel %vm249_vm3, %v877_v36, -inf  ;;  %v888_v49 = vsel %vm249_vm3, %v878_v45, -inf  ;;  %v732_v51 = vsel %vm724_vm1, %v720_v41, %v728_v47  ;;  %v727_v52 = vmul.f32 0.2, %v719_v48 }
 0x6fa   :  { %vm723_vm2 = vcmp.gt.f32.partialorder %v719_v48, 0.0  ;;  %v738_v57 = vsel %vm249_vm3, %v734_v50, -inf  ;;  %v736_v58 = vadd.f32 %v732_v51, %v1478_v44  ;;  %v729_v60 = vmul.f32 0.2, %v721_v56 }
 0x6fb   :  { %v731_v12 = vsel %vm723_vm2, %v719_v48, %v727_v52  ;;  %vm725_vm4 = vcmp.gt.f32.partialorder %v721_v56, 0.0 }
 0x6fc   :  { %v744_v61 = vsel %vm249_vm3, %v736_v58, -inf  ;;  %v735_v62 = vadd.f32 %v731_v12, %v1468_v37  ;;  %v733_v63 = vsel %vm725_vm4, %v721_v56, %v729_v60 }
 0x6fd   :  { %886 = vmax.xlane.f32.xlu1 %v885_v43  ;;  %v737_v0 = vadd.f32 %v733_v63, %v1488_v54 }
 0x6fe   :  { %v741_v38 = vsel %vm249_vm3, %v735_v62, -inf }
 0x6ff   :  { %v747_v2 = vsel %vm249_vm3, %v737_v0, -inf }
 0x701   :  { %889 = vmax.xlane.f32.xlu1 %v888_v49 }
 0x705   :  { %739 = vmax.xlane.f32.xlu1 %v738_v57 }
 0x709   :  { %745 = vmax.xlane.f32.xlu1 %v744_v61 }
 0x70d   :  { %742 = vmax.xlane.f32.xlu1 %v741_v38 }
 0x711   :  { %748 = vmax.xlane.f32.xlu1 %v747_v2 }
 0x782   :  { %v881_v4 = vpop.xlane.xlu1 %880  ;;  %v884_v5 = vpop.xlane.xlu0 %883 }
 0x783   :  { %v891_v44 = vsub.f32 %v875_v27, %v881_v4  ;;  %v892_v8 = vsub.f32 %v876_v24, %v884_v5 }
 0x785   :  { %v895_v9 = vmul.f32 1.442695, %v891_v44  ;;  %v897_v13 = vmul.f32 1.442695, %v892_v8 }
 0x786   :  { %v887_v6 = vpop.xlane.xlu1 %886 }
 0x787   :  { %v893_v7 = vsub.f32 %v877_v36, %v887_v6 }
 0x789   :  { %v899_v10 = vmul.f32 1.442695, %v893_v7 }
 0x78a   :  { %v890_v11 = vpop.xlane.xlu1 %889 }
 0x78b   :  { %1314 = vpow2.f32 %v899_v10  ;;  %v894_v37 = vsub.f32 %v878_v45, %v890_v11 }
 0x78c   :  { %1316 = vpow2.f32 %v895_v9 }
 0x78d   :  { %v901_v15 = vmul.f32 1.442695, %v894_v37 }
 0x78e   :  { %v740_v23 = vpop.xlane.xlu1 %739 }
 0x78f   :  { %1318 = vpow2.f32 %v901_v15  ;;  %v750_v31 = vsub.f32 %v734_v50, %v740_v23 }
 0x790   :  { %1320 = vpow2.f32 %v897_v13 }
 0x791   :  { %v754_v27 = vmul.f32 1.442695, %v750_v31 }
 0x792   :  { %v746_v25 = vpop.xlane.xlu1 %745 }
 0x793   :  { %v752_v24 = vsub.f32 %v736_v58, %v746_v25 }
 0x795   :  { %v758_v34 = vmul.f32 1.442695, %v752_v24 }
 0x796   :  { %v743_v26 = vpop.xlane.xlu1 %742 }
 0x797   :  { %v751_v29 = vsub.f32 %v735_v62, %v743_v26 }
 0x798   :  { %v1585_v54 = vpop.eup %1314 }
 0x799   :  { %v909_v16 = vsel %vm249_vm3, %v1585_v54, 0.0  ;;  %v1317_v17 = vpop.eup %1316  ;;  %v756_v32 = vmul.f32 1.442695, %v751_v29 }
 0x79a   :  { %910 = vadd.xlane.f32.xlu1 %v909_v16  ;;  %v903_v18 = vsel %vm249_vm3, %v1317_v17, 0.0  ;;  %v749_v30 = vpop.xlane.xlu1 %748 }
 0x79b   :  { %v753_v33 = vsub.f32 %v737_v0, %v749_v30  ;;  %1322 = vpow2.f32 %v756_v32 }
 0x79c   :  { %v1319_v19 = vpop.eup %1318  ;;  %1324 = vpow2.f32 %v754_v27 }
 0x79d   :  { %v912_v20 = vsel %vm249_vm3, %v1319_v19, 0.0  ;;  %v1321_v21 = vpop.eup %1320  ;;  %v760_v28 = vmul.f32 1.442695, %v753_v33 }
 0x79e   :  { %904 = vadd.xlane.f32.xlu1 %v903_v18  ;;  %913 = vadd.xlane.f32.xlu0 %v912_v20  ;;  %v906_v22 = vsel %vm249_vm3, %v1321_v21, 0.0  ;;  %v1166_v20 = vld [vmem:[%s1643_s7] ss:$0 sm:$0xff] }
 0x79f   :  { %1326 = vpow2.f32 %v760_v28 }
 0x7a0   :  { %1328 = vpow2.f32 %v758_v34 }
 0x7a2   :  { %907 = vadd.xlane.f32.xlu1 %v906_v22 }
 0x7a8   :  { %v1323_v35 = vpop.eup %1322 }
 0x7a9   :  { %v1325_v36 = vpop.eup %1324 }
 0x7ac   :  { %v1327_v39 = vpop.eup %1326 }
 0x7ad   :  { %v771_v40 = vsel %vm249_vm3, %v1327_v39, 0.0  ;;  %v1329_v41 = vpop.eup %1328 }
 0x7ae   :  { %v768_v42 = vsel %vm249_vm3, %v1329_v41, 0.0 }
 0x7b3   :  { %929 = vrot.lane.b32.xlu1 %v1552_v1, %s1370_s1  ;;  %v765_v1 = vsel %vm249_vm3, %v1323_v35, 0.0 }
 0x7b4   :  { %927 = vrot.lane.b32.xlu0 %v1554_v3, %s1370_s1  ;;  %v762_v3 = vsel %vm249_vm3, %v1325_v36, 0.0 }
 0x7d3   :  { %766 = vadd.xlane.f32.xlu0 %v765_v1 }
 0x7d7   :  { %763 = vadd.xlane.f32.xlu1 %v762_v3  ;;  %772 = vadd.xlane.f32.xlu0 %v771_v40  ;;  %v1281_v40 = vld [vmem:[%s1644_s8 + $0x8] sm:$0xff]  }
 0x7db   :  { %769 = vadd.xlane.f32.xlu1 %v768_v42 }
 0x823   :  { %v911_v43 = vpop.xlane.xlu1 %910 }
 0x827   :  { %v914_v45 = vpop.xlane.xlu0 %913  ;;  %v905_v46 = vpop.xlane.xlu1 %904 }
 0x828   :  { %1330 = vrcp.f32 %v914_v45 }
 0x829   :  { %1332 = vrcp.f32 %v905_v46 }
 0x82a   :  { %1334 = vrcp.f32 %v911_v43 }
 0x82b   :  { %v908_v47 = vpop.xlane.xlu1 %907  ;;  %v928_v49 = vpop.permute.xlu0 %927 }
 0x82c   :  { %1336 = vrcp.f32 %v908_v47 }
 0x82f   :  { %v930_v48 = vpop.permute.xlu1 %929 }
 0x830   :  { %1250 = vmatprep.subr.bf16.mxu1 %v930_v48 }
 0x831   :  { %1251 = vmatpush3.bf16.msra.mxu1 %v930_v48 }
 0x832   :  { %1252 = vmatprep.subr.bf16.mxu1 %v928_v49 }
 0x835   :  { %1253 = vmatpush3.bf16.msra.mxu1 %v928_v49  ;;  %v1331_v50 = vpop.eup %1330 }
 0x836   :  { %v1333_v51 = vpop.eup %1332  ;;  %v922_v57 = vmul.f32 %v1331_v50, %v1319_v19 }
 0x837   :  { %v1335_v52 = vpop.eup %1334  ;;  %v919_v58 = vmul.f32 %v1333_v51, %v1317_v17 }
 0x838   :  { %v921_v60 = vmul.f32 %v1335_v52, %v1585_v54 }
 0x839   :  { %v1337_v56 = vpop.eup %1336 }
 0x83a   :  { %v920_v12 = vmul.f32 %v1337_v56, %v1321_v21  ;;  %v924_v62 = vpack.c.bf16 %v922_v57, %v921_v60 }
 0x83c   :  { %v923_v61 = vpack.c.bf16 %v920_v12, %v919_v58 }
 0x83e   :  { %1254 = vmatprep.mubr.msk.bf16.mxu1 %vm249_vm3, %v923_v61 }
 0x83f   :  { %1255 = vmatmul.mubr.msk.bf16.vlgmr.msra.gmra.mxu1 %vm249_vm3, %v924_v62 }
 0x85c   :  { %v767_v63 = vpop.xlane.xlu0 %766 }
 0x85d   :  { %1338 = vrcp.f32 %v767_v63 }
 0x860   :  { %v773_v38 = vpop.xlane.xlu0 %772  ;;  %v764_v0 = vpop.xlane.xlu1 %763 }
 0x861   :  { %1340 = vrcp.f32 %v764_v0 }
 0x862   :  { %1342 = vrcp.f32 %v773_v38 }
 0x864   :  { %v770_v2 = vpop.xlane.xlu1 %769 }
 0x865   :  { %1344 = vrcp.f32 %v770_v2 }
 0x86a   :  { %v1339_v4 = vpop.eup %1338 }
 0x86b   :  { %v779_v7 = vmul.f32 %v1339_v4, %v1323_v35  ;;  %v1280_v35 = vld [vmem:[%s1644_s8] sm:$0xff]  }
 0x86e   :  { %v1341_v44 = vpop.eup %1340 }
 0x86f   :  { %v1343_v5 = vpop.eup %1342  ;;  %v778_v6 = vmul.f32 %v1341_v44, %v1325_v36 }
 0x870   :  { %v781_v11 = vmul.f32 %v1343_v5, %v1327_v39 }
 0x871   :  { %v782_v9 = vpack.c.bf16 %v779_v7, %v778_v6 }
 0x872   :  { %v1345_v8 = vpop.eup %1344 }
 0x873   :  { %v780_v10 = vmul.f32 %v1345_v8, %v1329_v41  ;;  %1246 = vmatprep.mubr.msk.bf16.mxu0 %vm249_vm3, %v782_v9 }
 0x875   :  { %v783_v37 = vpack.c.bf16 %v781_v11, %v780_v10 }
 0x877   :  { %1247 = vmatmul.mubr.msk.bf16.vlgmr.msra.gmra.mxu0 %vm249_vm3, %v783_v37 }
 0x878   :  { %1260 = vmatprep.mubr.msk.bf16.mxu0 %vm52_vm0, %v1280_v35 }
 0x8ff   :  { %v1256_v13 = vpop.f32.mrf.mxu1 }
 0x901   :  { %v973_v15 = vpop.f32.mrf.mxu1 }
 0x902   :  { %992 = vrot.lane.b32.xlu1 %v973_v15, %s1371_s28 }
 0x903   :  { %v1257_v54 = vpop.f32.mrf.mxu1 }
 0x905   :  { %v976_v16 = vpop.f32.mrf.mxu1 }
 0x906   :  { %996 = vrot.lane.b32.xlu1 %v1256_v13, %s1371_s28  ;;  %994 = vrot.lane.b32.xlu0 %v976_v16, %s1371_s28 }
 0x90a   :  { %998 = vrot.lane.b32.xlu1 %v1257_v54, %s1371_s28 }
 0x937   :  { %v1248_v17 = vpop.f32.mrf.mxu0 }
 0x939   :  { %v824_v19 = vpop.f32.mrf.mxu0 }
 0x93b   :  { %v1249_v18 = vpop.f32.mrf.mxu0 }
 0x93d   :  { %v827_v25 = vpop.f32.mrf.mxu0 }
 0x974   :  { %v993_v21 = vpop.permute.xlu1 %992 }
 0x975   :  { %v1004_v22 = vsel %vm516_vm10, %v824_v19, %v993_v21 }
 0x976   :  { %v1015_v23 = vadd.f32 %v1166_v20, %v1004_v22 }
 0x978   :  { %v1019_v26 = vadd.f32 %v1015_v23, %v1533_v53  ;;  %v995_v29 = vpop.permute.xlu0 %994  ;;  %v997_v30 = vpop.permute.xlu1 %996 }
 0x979   :  { %v1005_v31 = vsel %vm516_vm10, %v827_v25, %v995_v29  ;;  %v1006_v32 = vsel %vm516_vm10, %v1248_v17, %v997_v30 }
 0x97a   :  { %v1016_v33 = vadd.f32 %v1166_v20, %v1005_v31  ;;  %1023 = vxpose.xlu0.b32.start [1/4] (short) (narrow) %v1019_v26, 16  ;;  %v1017_v24 = vadd.f32 %v1166_v20, %v1006_v32 }
 0x97c   :  { %v1020_v27 = vadd.f32 %v1016_v33, %v1535_v55  ;;  %v999_v28 = vpop.permute.xlu1 %998  ;;  %v1021_v53 = vadd.f32 %v1017_v24, %v1541_v59 }
 0x97d   :  { %v1007_v34 = vsel %vm516_vm10, %v1249_v18, %v999_v28 }
 0x97e   :  { %1024 = vxpose.xlu0.b32.cont [2/4] (short) (narrow) %v1020_v27, 16  ;;  %v1018_v36 = vadd.f32 %v1166_v20, %v1007_v34 }
 0x980   :  { %v1022_v1 = vadd.f32 %v1018_v36, %v1543_v14 }
 0x982   :  { %1025 = vxpose.xlu0.b32.cont [3/4] (short) (narrow) %v1021_v53, 16 }
 0x986   :  { %1026 = vxpose.xlu0.b32.end [4/4] (short) (narrow) %v1022_v1, 16 }
 0x9f6   :  { %v1039_v39 = vpop.trf.xlu0 }
 0x9fa   :  { %v1040_v55 = vpop.trf.xlu0 }
 0x9fb   :  { %v1059_v3 = vpack.c.bf16 %v1040_v55, %v1039_v39 }
 0x9fd   :  { %1258 = vmatprep.subr.bf16.mxu0 %v1059_v3 }
 0x9fe   :  { %1259 = vmatpush3.bf16.msra.mxu0 %v1059_v3 }
 0xa01   :  { %1261 = vmatmul.mubr.msk.bf16.vlgmr.msra.gmra.mxu0 %vm52_vm0, %v1281_v40 }
 0xac1   :  { %v1262_v41 = vpop.f32.mrf.mxu0 }
 0xac2   :  { %1127 = vst.msk [vmem:[#allocation2 + $0x10] sm:$0xff] %vm249_vm3, %v1262_v41 }
 0xac3   :  { %v1110_v59 = vpop.f32.mrf.mxu0 }
 0xac4   :  { %1125 = vst.msk [vmem:[#allocation2] sm:$0xff] %vm249_vm3, %v1110_v59 }
 0xac5   :  { %v1263_v14 = vpop.f32.mrf.mxu0 }
 0xac6   :  { %1128 = vst.msk [vmem:[#allocation2 + $0x18] sm:$0xff] %vm249_vm3, %v1263_v14 }
 0xac7   :  { %v1113_v42 = vpop.f32.mrf.mxu0 }
 0xac8   :  { %1126 = vst.msk [vmem:[#allocation2 + $0x8] sm:$0xff] %vm249_vm3, %v1113_v42 }
 0xac9   :  { %1357 = shalt.err (!%p1354_p4)
}
 0xaca   :  { %s1373_s8 = smov 128  }
 0xacb   :  { %1140 = dma.vmem_to_hbm [thread:$0]  %s1135_s15, 512, %s1645_s9, [#allocation3], %s1373_s8, %s1373_s8, %s1371_s28  }
 0xacc   :  { %1366 = dma.done.wait [#allocation3], 512  }
 0xacd   :  { %1367 = vsyncadd [#allocation3], 4294966784 }
 0xace   :  { %1144 = vsyncpa [#allocation3], 1 }

</bundles_post_ra>
